<compile_context>
chip_gen: v7x
topology: tpu7x:2x2x1
jax: 0.10.0
libtpu: 0.0.40
codegen_flags: <defaults>
</compile_context>

<pallas_src>
import jax
import jax.numpy as jnp
from jax.experimental import pallas as pl
from jax.experimental.pallas import tpu as pltpu


# -----------------------------------------------------------------------------
# Kernels: raw HBM -> HBM async DMA copies (no VMEM pipeline, no compute).
# -----------------------------------------------------------------------------
def _dma_identity_single_kernel(y_hbm, oy_hbm, sems):
    cp = pltpu.make_async_copy(y_hbm, oy_hbm, sems.at[0])
    cp.start()
    cp.wait()


def _dma_identity_pair_kernel(y_hbm, v_hbm, oy_hbm, ov_hbm, sems):
    # Start both copies before waiting so the DMA engines overlap them.
    cy = pltpu.make_async_copy(y_hbm, oy_hbm, sems.at[0])
    cv = pltpu.make_async_copy(v_hbm, ov_hbm, sems.at[1])
    cy.start()
    cv.start()
    cy.wait()
    cv.wait()


# -----------------------------------------------------------------------------
# pallas_call wrappers (jit'ed so wrapper dispatch doesn't dominate tiny inputs)
# -----------------------------------------------------------------------------
_ANY_SPEC = pl.BlockSpec(memory_space=pl.ANY)


@jax.jit
def _pallas_copy_single(y):
    return pl.pallas_call(
        _dma_identity_single_kernel,
        out_shape=jax.ShapeDtypeStruct(y.shape, y.dtype),
        in_specs=[_ANY_SPEC],
        out_specs=_ANY_SPEC,
        scratch_shapes=[pltpu.SemaphoreType.DMA((2,))],
    )(y)


@jax.jit
def _pallas_copy_pair(y, v):
    return pl.pallas_call(
        _dma_identity_pair_kernel,
        out_shape=(jax.ShapeDtypeStruct(y.shape, y.dtype),
                   jax.ShapeDtypeStruct(v.shape, v.dtype)),
        in_specs=[_ANY_SPEC, _ANY_SPEC],
        out_specs=(_ANY_SPEC, _ANY_SPEC),
        scratch_shapes=[pltpu.SemaphoreType.DMA((2,))],
    )(y, v)


def _pallas_identity(x):
    x = jnp.asarray(x)
    if x.size == 0:
        return x
    return _pallas_copy_single(x)


# -----------------------------------------------------------------------------
# Public API (mirrors _EmptyTransform)
# -----------------------------------------------------------------------------
def empty_transform_forward(Y, Yvar=None):
    """Exact _EmptyTransform.forward semantics: pure identity (no copy)."""
    return (Y, Yvar)


def empty_transform_forward_pallas(Y, Yvar=None):
    """Identity that materializes a copy through a single Pallas call.

    Uses raw HBM->HBM async DMA (no VMEM pipeline, no padding/reshapes),
    fusing Y and Yvar into one pallas_call when both are present.
    Prefer `empty_transform_forward` when no pallas boundary is required.
    """
    Y = jnp.asarray(Y)
    if Yvar is None:
        return (_pallas_identity(Y), None)

    Yvar = jnp.asarray(Yvar)
    if Y.size == 0 or Yvar.size == 0:
        return (_pallas_identity(Y), _pallas_identity(Yvar))
    oy, ov = _pallas_copy_pair(Y, Yvar)
    return (oy, ov)


def empty_transform_untransform(Y, Yvar=None):
    return empty_transform_forward(Y, Yvar)


def empty_transform_untransform_posterior(posterior):
    # TODO(synk): posteriors are arbitrary Python objects; identity pass-through.
    return posterior


# -----------------------------------------------------------------------------
# Demo / self-test
# -----------------------------------------------------------------------------
if __name__ == "__main__":
    key = jax.random.PRNGKey(0)
    k1, k2, k3, k4 = jax.random.split(key, 4)

    # Small shapes consistent with a BoTorch-style transform: (batch, q, m).
    Y = jax.random.normal(k1, (2, 8, 4), dtype=jnp.float32)
    Yvar = jax.nn.softplus(jax.random.normal(k2, (2, 8, 4), dtype=jnp.float32))

    # 1) Primary path: true identity — returns the inputs themselves.
    Y0, Yvar0 = empty_transform_forward(Y, Yvar)
    assert Y0 is Y and Yvar0 is Yvar

    # 2) Pallas path: fused pair copy via HBM->HBM DMA.
    Y1, Yvar1 = empty_transform_forward_pallas(Y, Yvar)
    jax.block_until_ready(Y1)
    jax.block_until_ready(Yvar1)
    assert Y1.shape == Y.shape and Y1.dtype == Y.dtype
    assert Yvar1.shape == Yvar.shape and Yvar1.dtype == Yvar.dtype
    assert bool(jnp.all(Y1 == Y)) and bool(jnp.all(Yvar1 == Yvar))

    # 3) Yvar=None path (exact PyTorch semantics).
    Y2, none_out = empty_transform_forward_pallas(Y, None)
    jax.block_until_ready(Y2)
    assert none_out is None
    assert bool(jnp.all(Y2 == Y))

    # 4) Larger input: same single-DMA copy, no tiling / padding machinery.
    Yb = jax.random.normal(k3, (5, 700, 128), dtype=jnp.float32)
    Yb1, _ = empty_transform_forward_pallas(Yb, None)
    jax.block_until_ready(Yb1)
    assert Yb1.shape == Yb.shape and bool(jnp.all(Yb1 == Yb))

    # 5) Awkward shape / non-f32 dtype: works with zero layout plumbing.
    Yc = jax.random.normal(k4, (3, 50, 7), dtype=jnp.bfloat16)
    Yc1, _ = empty_transform_forward_pallas(Yc, None)
    jax.block_until_ready(Yc1)
    assert Yc1.shape == Yc.shape and Yc1.dtype == Yc.dtype
    assert bool(jnp.all(Yc1 == Yc))

    # 6) untransform / untransform_posterior pass-throughs.
    U, Uv = empty_transform_untransform(Y, Yvar)
    assert U is Y and Uv is Yvar
    assert empty_transform_untransform_posterior(object()) is not None

    print("KERNEL_OK")
</pallas_src>

<mosaic_0001>
module attributes {stable_mosaic.version = 11 : i64} {
  func.func @_dma_identity_pair_kernel(%arg0: memref<2x8x4xf32, #tpu.memory_space<any>>, %arg1: memref<2x8x4xf32, #tpu.memory_space<any>>, %arg2: memref<2x8x4xf32, #tpu.memory_space<any>>, %arg3: memref<2x8x4xf32, #tpu.memory_space<any>>, %arg4: memref<2x!tpu.dma_semaphore, #tpu.memory_space<semaphore_mem>>) attributes {dimension_semantics = [], scalar_prefetch = 0 : i64, scratch_operands = 1 : i64, tpu.core_type = #tpu.core_type<tc>} {
    %c0_i32 = arith.constant 0 : i32
    %0 = tpu.memref_slice %arg4[%c0_i32] : memref<2x!tpu.dma_semaphore, #tpu.memory_space<semaphore_mem>> -> memref<1x!tpu.dma_semaphore, #tpu.memory_space<semaphore_mem>>
    %1 = tpu.memref_squeeze %0 : memref<1x!tpu.dma_semaphore, #tpu.memory_space<semaphore_mem>> -> memref<!tpu.dma_semaphore, #tpu.memory_space<semaphore_mem>>
    tpu.enqueue_dma source(%arg0 : memref<2x8x4xf32, #tpu.memory_space<any>>) target(%arg2 : memref<2x8x4xf32, #tpu.memory_space<any>>) target_semaphore(%1 : memref<!tpu.dma_semaphore, #tpu.memory_space<semaphore_mem>>)
    %c1_i32 = arith.constant 1 : i32
    %2 = tpu.memref_slice %arg4[%c1_i32] : memref<2x!tpu.dma_semaphore, #tpu.memory_space<semaphore_mem>> -> memref<1x!tpu.dma_semaphore, #tpu.memory_space<semaphore_mem>>
    %3 = tpu.memref_squeeze %2 : memref<1x!tpu.dma_semaphore, #tpu.memory_space<semaphore_mem>> -> memref<!tpu.dma_semaphore, #tpu.memory_space<semaphore_mem>>
    tpu.enqueue_dma source(%arg1 : memref<2x8x4xf32, #tpu.memory_space<any>>) target(%arg3 : memref<2x8x4xf32, #tpu.memory_space<any>>) target_semaphore(%3 : memref<!tpu.dma_semaphore, #tpu.memory_space<semaphore_mem>>)
    %c0_i32_0 = arith.constant 0 : i32
    %4 = tpu.memref_slice %arg4[%c0_i32_0] : memref<2x!tpu.dma_semaphore, #tpu.memory_space<semaphore_mem>> -> memref<1x!tpu.dma_semaphore, #tpu.memory_space<semaphore_mem>>
    %5 = tpu.memref_squeeze %4 : memref<1x!tpu.dma_semaphore, #tpu.memory_space<semaphore_mem>> -> memref<!tpu.dma_semaphore, #tpu.memory_space<semaphore_mem>>
    tpu.wait_dma2 semaphore(%5 : memref<!tpu.dma_semaphore, #tpu.memory_space<semaphore_mem>>) src(%arg0 : memref<2x8x4xf32, #tpu.memory_space<any>>) dst(%arg2 : memref<2x8x4xf32, #tpu.memory_space<any>>)
    %c1_i32_1 = arith.constant 1 : i32
    %6 = tpu.memref_slice %arg4[%c1_i32_1] : memref<2x!tpu.dma_semaphore, #tpu.memory_space<semaphore_mem>> -> memref<1x!tpu.dma_semaphore, #tpu.memory_space<semaphore_mem>>
    %7 = tpu.memref_squeeze %6 : memref<1x!tpu.dma_semaphore, #tpu.memory_space<semaphore_mem>> -> memref<!tpu.dma_semaphore, #tpu.memory_space<semaphore_mem>>
    tpu.wait_dma2 semaphore(%7 : memref<!tpu.dma_semaphore, #tpu.memory_space<semaphore_mem>>) src(%arg1 : memref<2x8x4xf32, #tpu.memory_space<any>>) dst(%arg3 : memref<2x8x4xf32, #tpu.memory_space<any>>)
    return
  }
}

</mosaic_0001>

<bundles_post_ra>
// kernel: _pallas_copy_pair.1
= control target key start
LH: loop header
LB: loop body
LE: loop exit
PB: predicated region body
PF: predicated region fallthrough
CT: control target
= control target key end

     0   :  { %s183_s0 = inlined_call_operand.vmem [shape: f32[2,8,4], index: 0, kind: input, shape index: {}]   ;;  %s184_s1 = inlined_call_operand.vmem [shape: f32[2,8,4], index: 1, kind: input, shape index: {}]   ;;  %s185_s2 = inlined_call_operand.vmem [shape: f32[2,8,4], index: 2, kind: output, shape index: {0}]   ;;  %s186_s3 = inlined_call_operand.vmem [shape: f32[2,8,4], index: 3, kind: output, shape index: {1}]  }
   0x1   :  { %v41_v0 = vld [vmem:[%s183_s0] sm:$0xff]  ;;  %v43_v1 = vld [vmem:[%s183_s0 + $0x8] sm:$0xff] }
   0x2   :  { %42 = vst [vmem:[%s185_s2] sm:$0xff] %v41_v0  ;;  %44 = vst [vmem:[%s185_s2 + $0x8] sm:$0xff] %v43_v1 }
   0x3   :  { %52 = vsyncadd [#allocation2], 256  ;;  %v86_v2 = vld [vmem:[%s184_s1] sm:$0xff]  ;;  %v88_v3 = vld [vmem:[%s184_s1 + $0x8] sm:$0xff] }
   0x4   :  { %87 = vst [vmem:[%s186_s3] sm:$0xff] %v86_v2  ;;  %89 = vst [vmem:[%s186_s3 + $0x8] sm:$0xff] %v88_v3 }
   0x5   :  { %97 = vsyncadd [#allocation2 + $0x1], 256 }
   0x6   :  { %135 = dma.done.wait [#allocation2], 256 }
   0x7   :  { %136 = vsyncadd [#allocation2], 4294967040 }
   0x8   :  { %137 = dma.done.wait [#allocation2 + $0x1], 256 }
   0x9   :  { %138 = vsyncadd [#allocation2 + $0x1], 4294967040 }
   0xa   :  { %104 = vsyncmov [#allocation2] }
   0xd   :  { %s105_s2 = vpop.sfrf %104 }
   0xe   :  { %p133_p0 = scmp.ne.s32.totalorder %s105_s2, 0 }
  0x10   :  { %109 = shalt.err (%p133_p0)  }
  0x11   :  { %111 = vsyncmov [#allocation2 + $0x1] }
  0x14   :  { %s112_s27 = vpop.sfrf %111 }
  0x15   :  { %p134_p1 = scmp.ne.s32.totalorder %s112_s27, 0 }
  0x17   :  { %116 = shalt.err (%p134_p1)  }

</bundles_post_ra>
